<compile_context>
chip_gen: v6e
topology: v6e:2x2x1
jax: 0.10.0
libtpu: 0.0.40
codegen_flags: <defaults>
</compile_context>

<pallas_src>
import functools

import jax
import jax.numpy as jnp
from jax.experimental import pallas as pl
from jax.experimental.pallas import tpu as pltpu

NUM_LEVELS = 3
SUBLANE = 8            # f32 sublane count
CHUNK = 8              # graphs handled by one batched einsum group (sublane multiple)
MAX_BLOCK_BATCH = 256  # cap on graphs per grid step (bounds VMEM / value working set)


def _round_up(a, m):
    return -(-a // m) * m


def _hier_pool_kernel(x_ref, L_ref, S_ref, o_ref, *, num_levels, chunk):
    """One grid step = one block of `bb` graphs.

    x_ref: (bb, Np, Fp)              L_ref: (bb, num_levels, Np, Np)
    S_ref: (bb, num_levels, Fp, Fp)  o_ref: (bb, Np, Fp) f32
    """
    bb = x_ref.shape[0]
    n_chunks = bb // chunk

    def process(g0):
        # Serial L chain (apply_conv per level), batched over the chunk's graphs.
        x = x_ref[pl.ds(g0, chunk), :, :]
        for i in range(num_levels):
            Li = L_ref[pl.ds(g0, chunk), i, :, :]
            x = jnp.einsum("bij,bjf->bif", Li, x,
                           preferred_element_type=jnp.float32)

        # Fused S chain: S0 @ S1 @ ... ; independent of the serial L chain above,
        # so the MXU overlaps it.  No explicit f32 casts: bf16 inputs stay bf16
        # (native MXU path), accumulation is f32 via preferred_element_type.
        s_total = S_ref[pl.ds(g0, chunk), 0, :, :]
        for i in range(1, num_levels):
            Si = S_ref[pl.ds(g0, chunk), i, :, :]
            s_total = jnp.einsum("bfk,bkg->bfg", s_total, Si,
                                 preferred_element_type=jnp.float32)

        # update_vertex_sets(x): bookkeeping only -> nothing to do in-kernel.
        out = jnp.einsum("bnf,bfg->bng", x, s_total,
                         preferred_element_type=jnp.float32)
        o_ref[pl.ds(g0, chunk), :, :] = out.astype(o_ref.dtype)

    if n_chunks <= 4:
        for c in range(n_chunks):              # short static unroll
            process(c * chunk)
    else:
        def body(c, carry):                    # bounded live ranges for big blocks
            process(pl.multiple_of(c * chunk, chunk))
            return carry
        jax.lax.fori_loop(0, n_chunks, body, 0)


@functools.partial(jax.jit, static_argnames=("block_batch", "input_dtype"))
def hierarchical_pooling_batched(x, L, S, *, block_batch=None, input_dtype=jnp.bfloat16):
    """x: (B, N, F), L: (B, NL, N, N), S: (B, NL, F, F) -> (B, N, F) float32."""
    B, N, F = x.shape
    num_levels = L.shape[1]
    assert L.shape == (B, num_levels, N, N)
    assert S.shape == (B, num_levels, F, F)

    # ---- wrapper-side layout plumbing (cheap XLA ops) ----
    Np = _round_up(N, SUBLANE)   # 9 -> 16: sublane-aligned, unmasked sublane tiles
    Fp = _round_up(F, SUBLANE)

    if block_batch is None:
        if B <= CHUNK:
            bb = CHUNK
        else:
            # Keep >=2 grid steps so both v7x TensorCores get a block; otherwise a
            # single big block amortizes the ~0.35us/step + per-DMA fixed costs.
            bb = min(_round_up(pl.cdiv(B, 2), CHUNK), MAX_BLOCK_BATCH)
    else:
        bb = min(_round_up(block_batch, CHUNK), MAX_BLOCK_BATCH)
    Bp = _round_up(max(B, bb), bb)
    num_blocks = Bp // bb

    # bf16 inputs halve HBM->VMEM DMA bytes; zero padding keeps rows 0..N-1 exact.
    xp = jnp.zeros((Bp, Np, Fp), input_dtype).at[:B, :N, :F].set(x.astype(input_dtype))
    Lp = jnp.zeros((Bp, num_levels, Np, Np), input_dtype).at[:B, :, :N, :N].set(
        L.astype(input_dtype))
    Sp = jnp.zeros((Bp, num_levels, Fp, Fp), input_dtype).at[:B, :, :F, :F].set(
        S.astype(input_dtype))

    flops = 2 * Bp * (num_levels * Np * Np * Fp
                      + (num_levels - 1) * Fp * Fp * Fp
                      + Np * Fp * Fp)
    bytes_accessed = (xp.size * xp.dtype.itemsize
                      + Lp.size * Lp.dtype.itemsize
                      + Sp.size * Sp.dtype.itemsize
                      + Bp * Np * Fp * 4)  # f32 output

    kernel = functools.partial(_hier_pool_kernel, num_levels=num_levels, chunk=CHUNK)

    out = pl.pallas_call(
        kernel,
        out_shape=jax.ShapeDtypeStruct((Bp, Np, Fp), jnp.float32),
        grid=(num_blocks,),
        in_specs=[
            pl.BlockSpec((bb, Np, Fp), lambda b: (b, 0, 0)),
            pl.BlockSpec((bb, num_levels, Np, Np), lambda b: (b, 0, 0, 0)),
            pl.BlockSpec((bb, num_levels, Fp, Fp), lambda b: (b, 0, 0, 0)),
        ],
        out_specs=pl.BlockSpec((bb, Np, Fp), lambda b: (b, 0, 0)),
        compiler_params=pltpu.CompilerParams(
            dimension_semantics=("parallel",),   # shards blocks across v7x's 2 TCs
        ),
        cost_estimate=pl.CostEstimate(
            flops=flops, transcendentals=0, bytes_accessed=bytes_accessed),
    )(xp, Lp, Sp)

    return out[:B, :N, :F]


def hierarchical_pooling(x, L, S, **kw):
    """Single-graph entry matching the module's forward.

    x: (N, F), L: (NUM_LEVELS, N, N), S: (NUM_LEVELS, F, F) -> (N, F).
    """
    return hierarchical_pooling_batched(x[None], L[None], S[None], **kw)[0]


def hierarchical_pooling_ref(x, L, S):
    # Level-by-level reference (matches the PyTorch forward exactly).
    for i in range(L.shape[0]):
        x = (L[i] @ x) @ S[i]
    return x


if __name__ == "__main__":
    # nodes dict in the reference has 9 entries; features = 16 (torch.rand((num_nodes, 16))).
    num_nodes, feat, batch = 9, 16, 32

    key = jax.random.PRNGKey(0)
    kx, kl, ks, kbx, kbl, kbs = jax.random.split(key, 6)

    # --- Single graph (module's forward signature), exact f32 path ---
    x = jax.random.uniform(kx, (num_nodes, feat), dtype=jnp.float32)
    L = jax.random.uniform(kl, (NUM_LEVELS, num_nodes, num_nodes), dtype=jnp.float32) * 0.1
    S = jax.random.uniform(ks, (NUM_LEVELS, feat, feat), dtype=jnp.float32) * 0.1

    out = jax.block_until_ready(hierarchical_pooling(x, L, S, input_dtype=jnp.float32))
    ref = hierarchical_pooling_ref(x, L, S)
    assert out.shape == (num_nodes, feat)
    # The in-kernel S-chain fusion reassociates the float products -> tiny f32 drift allowed.
    assert jnp.allclose(out, ref, atol=1e-5, rtol=1e-5), "Pallas mismatch (single graph, f32)"

    # --- Batched graphs: one pallas_call, 2 parallel grid steps of 16 graphs each ---
    xb = jax.random.uniform(kbx, (batch, num_nodes, feat), dtype=jnp.float32)
    Lb = jax.random.uniform(kbl, (batch, NUM_LEVELS, num_nodes, num_nodes), dtype=jnp.float32) * 0.1
    Sb = jax.random.uniform(kbs, (batch, NUM_LEVELS, feat, feat), dtype=jnp.float32) * 0.1
    refb = jax.vmap(hierarchical_pooling_ref)(xb, Lb, Sb)

    out_f32 = jax.block_until_ready(
        hierarchical_pooling_batched(xb, Lb, Sb, input_dtype=jnp.float32))
    assert out_f32.shape == (batch, num_nodes, feat)
    assert jnp.allclose(out_f32, refb, atol=1e-5, rtol=1e-5), "Pallas mismatch (batched, f32)"

    # Default path: bf16 inputs (halved DMA bytes), f32 accumulation -> wider tolerance
    # covers only the bf16 input rounding, not the math structure.
    out_bf16 = jax.block_until_ready(hierarchical_pooling_batched(xb, Lb, Sb))
    assert out_bf16.shape == (batch, num_nodes, feat)
    assert jnp.allclose(out_bf16, refb, rtol=5e-2, atol=1e-3), "Pallas mismatch (batched, bf16)"

    print("KERNEL_OK")
</pallas_src>

<mosaic_0001>
module attributes {stable_mosaic.version = 11 : i64} {
  func.func @_hier_pool_kernel(%arg0: i32, %arg1: memref<8x16x16xf32, #tpu.memory_space<vmem>>, %arg2: memref<8x3x16x16xf32, #tpu.memory_space<vmem>>, %arg3: memref<8x3x16x16xf32, #tpu.memory_space<vmem>>, %arg4: memref<8x16x16xf32, #tpu.memory_space<vmem>>) attributes {dimension_semantics = [#tpu.dimension_semantics<parallel>], iteration_bounds = array<i64: 1>, scalar_prefetch = 0 : i64, scratch_operands = 0 : i64, tpu.core_type = #tpu.core_type<tc>, window_params = [{transform_indices = @transform_0, window_bounds = array<i64: 8, 16, 16>}, {transform_indices = @transform_1, window_bounds = array<i64: 8, 3, 16, 16>}, {transform_indices = @transform_2, window_bounds = array<i64: 8, 3, 16, 16>}, {transform_indices = @transform_3, window_bounds = array<i64: 8, 16, 16>}]} {
    %c0 = arith.constant 0 : index
    %c0_0 = arith.constant 0 : index
    %c0_1 = arith.constant 0 : index
    %0 = vector.load %arg1[%c0, %c0_0, %c0_1] : memref<8x16x16xf32, #tpu.memory_space<vmem>>, vector<8x16x16xf32>
    %c0_2 = arith.constant 0 : index
    %c0_3 = arith.constant 0 : index
    %c0_4 = arith.constant 0 : index
    %c0_5 = arith.constant 0 : index
    %1 = vector.load %arg2[%c0_2, %c0_3, %c0_4, %c0_5] : memref<8x3x16x16xf32, #tpu.memory_space<vmem>>, vector<8x1x16x16xf32>
    %2 = vector.shape_cast %1 : vector<8x1x16x16xf32> to vector<8x16x16xf32>
    "tpu.trace_start"() <{level = 10 : i32, message = "bij,bjf->bif"}> : () -> ()
    %cst = arith.constant dense<0.000000e+00> : vector<8x16x16xf32>
    %3 = tpu.matmul %2, %0, %cst {dimension_numbers = #tpu.dot_dimension_numbers<[2], [1], [1], [2], [0, 0, 0, 1, 1, 2], [0], [0]>} : vector<8x16x16xf32>, vector<8x16x16xf32>, vector<8x16x16xf32> -> vector<8x16x16xf32>
    "tpu.trace_stop"() : () -> ()
    %c0_6 = arith.constant 0 : index
    %c1 = arith.constant 1 : index
    %c0_7 = arith.constant 0 : index
    %c0_8 = arith.constant 0 : index
    %4 = vector.load %arg2[%c0_6, %c1, %c0_7, %c0_8] : memref<8x3x16x16xf32, #tpu.memory_space<vmem>>, vector<8x1x16x16xf32>
    %5 = vector.shape_cast %4 : vector<8x1x16x16xf32> to vector<8x16x16xf32>
    "tpu.trace_start"() <{level = 10 : i32, message = "bij,bjf->bif"}> : () -> ()
    %cst_9 = arith.constant dense<0.000000e+00> : vector<8x16x16xf32>
    %6 = tpu.matmul %5, %3, %cst_9 {dimension_numbers = #tpu.dot_dimension_numbers<[2], [1], [1], [2], [0, 0, 0, 1, 1, 2], [0], [0]>} : vector<8x16x16xf32>, vector<8x16x16xf32>, vector<8x16x16xf32> -> vector<8x16x16xf32>
    "tpu.trace_stop"() : () -> ()
    %c0_10 = arith.constant 0 : index
    %c2 = arith.constant 2 : index
    %c0_11 = arith.constant 0 : index
    %c0_12 = arith.constant 0 : index
    %7 = vector.load %arg2[%c0_10, %c2, %c0_11, %c0_12] : memref<8x3x16x16xf32, #tpu.memory_space<vmem>>, vector<8x1x16x16xf32>
    %8 = vector.shape_cast %7 : vector<8x1x16x16xf32> to vector<8x16x16xf32>
    "tpu.trace_start"() <{level = 10 : i32, message = "bij,bjf->bif"}> : () -> ()
    %cst_13 = arith.constant dense<0.000000e+00> : vector<8x16x16xf32>
    %9 = tpu.matmul %8, %6, %cst_13 {dimension_numbers = #tpu.dot_dimension_numbers<[2], [1], [1], [2], [0, 0, 0, 1, 1, 2], [0], [0]>} : vector<8x16x16xf32>, vector<8x16x16xf32>, vector<8x16x16xf32> -> vector<8x16x16xf32>
    "tpu.trace_stop"() : () -> ()
    %c0_14 = arith.constant 0 : index
    %c0_15 = arith.constant 0 : index
    %c0_16 = arith.constant 0 : index
    %c0_17 = arith.constant 0 : index
    %10 = vector.load %arg3[%c0_14, %c0_15, %c0_16, %c0_17] : memref<8x3x16x16xf32, #tpu.memory_space<vmem>>, vector<8x1x16x16xf32>
    %11 = vector.shape_cast %10 : vector<8x1x16x16xf32> to vector<8x16x16xf32>
    %c0_18 = arith.constant 0 : index
    %c1_19 = arith.constant 1 : index
    %c0_20 = arith.constant 0 : index
    %c0_21 = arith.constant 0 : index
    %12 = vector.load %arg3[%c0_18, %c1_19, %c0_20, %c0_21] : memref<8x3x16x16xf32, #tpu.memory_space<vmem>>, vector<8x1x16x16xf32>
    %13 = vector.shape_cast %12 : vector<8x1x16x16xf32> to vector<8x16x16xf32>
    "tpu.trace_start"() <{level = 10 : i32, message = "bfk,bkg->bfg"}> : () -> ()
    %cst_22 = arith.constant dense<0.000000e+00> : vector<8x16x16xf32>
    %14 = tpu.matmul %11, %13, %cst_22 {dimension_numbers = #tpu.dot_dimension_numbers<[2], [1], [1], [2], [0, 0, 0, 1, 1, 2], [0], [0]>} : vector<8x16x16xf32>, vector<8x16x16xf32>, vector<8x16x16xf32> -> vector<8x16x16xf32>
    "tpu.trace_stop"() : () -> ()
    %c0_23 = arith.constant 0 : index
    %c2_24 = arith.constant 2 : index
    %c0_25 = arith.constant 0 : index
    %c0_26 = arith.constant 0 : index
    %15 = vector.load %arg3[%c0_23, %c2_24, %c0_25, %c0_26] : memref<8x3x16x16xf32, #tpu.memory_space<vmem>>, vector<8x1x16x16xf32>
    %16 = vector.shape_cast %15 : vector<8x1x16x16xf32> to vector<8x16x16xf32>
    "tpu.trace_start"() <{level = 10 : i32, message = "bfk,bkg->bfg"}> : () -> ()
    %cst_27 = arith.constant dense<0.000000e+00> : vector<8x16x16xf32>
    %17 = tpu.matmul %14, %16, %cst_27 {dimension_numbers = #tpu.dot_dimension_numbers<[2], [1], [1], [2], [0, 0, 0, 1, 1, 2], [0], [0]>} : vector<8x16x16xf32>, vector<8x16x16xf32>, vector<8x16x16xf32> -> vector<8x16x16xf32>
    "tpu.trace_stop"() : () -> ()
    "tpu.trace_start"() <{level = 10 : i32, message = "bnf,bfg->bng"}> : () -> ()
    %cst_28 = arith.constant dense<0.000000e+00> : vector<8x16x16xf32>
    %18 = tpu.matmul %9, %17, %cst_28 {dimension_numbers = #tpu.dot_dimension_numbers<[2], [1], [1], [2], [0, 0, 0, 1, 1, 2], [0], [0]>} : vector<8x16x16xf32>, vector<8x16x16xf32>, vector<8x16x16xf32> -> vector<8x16x16xf32>
    "tpu.trace_stop"() : () -> ()
    %c0_29 = arith.constant 0 : index
    %c0_30 = arith.constant 0 : index
    %c0_31 = arith.constant 0 : index
    %19 = vector.load %arg4[%c0_29, %c0_30, %c0_31] : memref<8x16x16xf32, #tpu.memory_space<vmem>>, vector<8x16x16xf32>
    tpu.vector_store %arg4[%c0_29, %c0_30, %c0_31], %18 {strides = array<i32>} : memref<8x16x16xf32, #tpu.memory_space<vmem>>, vector<8x16x16xf32>,
    return
  }
  func.func @transform_0(%arg0: i32) -> (i32, i32, i32) {
    %c0_i32 = arith.constant 0 : i32
    %c0_i32_0 = arith.constant 0 : i32
    %c0_i32_1 = arith.constant 0 : i32
    return %arg0, %c0_i32, %c0_i32_0 : i32, i32, i32
  }
  func.func @transform_1(%arg0: i32) -> (i32, i32, i32, i32) {
    %c0_i32 = arith.constant 0 : i32
    %c0_i32_0 = arith.constant 0 : i32
    %c0_i32_1 = arith.constant 0 : i32
    %c0_i32_2 = arith.constant 0 : i32
    return %arg0, %c0_i32, %c0_i32_0, %c0_i32_1 : i32, i32, i32, i32
  }
  func.func @transform_2(%arg0: i32) -> (i32, i32, i32, i32) {
    %c0_i32 = arith.constant 0 : i32
    %c0_i32_0 = arith.constant 0 : i32
    %c0_i32_1 = arith.constant 0 : i32
    %c0_i32_2 = arith.constant 0 : i32
    return %arg0, %c0_i32, %c0_i32_0, %c0_i32_1 : i32, i32, i32, i32
  }
  func.func @transform_3(%arg0: i32) -> (i32, i32, i32) {
    %c0_i32 = arith.constant 0 : i32
    %c0_i32_0 = arith.constant 0 : i32
    %c0_i32_1 = arith.constant 0 : i32
    return %arg0, %c0_i32, %c0_i32_0 : i32, i32, i32
  }
}

</mosaic_0001>

<bundles_post_ra>
// kernel: hierarchical_pooling_batched.1
= control target key start
LH: loop header
LB: loop body
LE: loop exit
PB: predicated region body
PF: predicated region fallthrough
CT: control target
= control target key end

     0   :  { %vm46_vm0 = vcmask 130048   ;;  %s5291_s0 = inlined_call_operand.vmem [shape: f32[8,16,16], index: 0, kind: input, shape index: {}]   ;;  %s5292_s1 = inlined_call_operand.vmem [shape: f32[8,3,16,16], index: 1, kind: input, shape index: {}]   ;;  %s5293_s2 = inlined_call_operand.vmem [shape: f32[8,3,16,16], index: 2, kind: input, shape index: {}]   ;;  %s5294_s3 = inlined_call_operand.vmem [shape: f32[8,16,16], index: 3, kind: output, shape index: {}]  }
   0x1   :  { %v15_v0 = vld [vmem:[%s5291_s0 + $0x8] sm:$0xff]  ;;  %v17_v1 = vld [vmem:[%s5291_s0 + $0x18] sm:$0xff]  ;;  %v14_v2 = vld [vmem:[%s5291_s0] sm:$0xff] }
   0x2   :  { %4391 = vmatprep.subr.mxu0 %v15_v0  ;;  %4398 = vmatprep.subr.mxu1 %v17_v1  ;;  %v16_v3 = vld [vmem:[%s5291_s0 + $0x10] sm:$0xff]  ;;  %v30_v4 = vld [vmem:[%s5292_s1] sm:$0xff]  ;;  %v31_v6 = vld [vmem:[%s5292_s1 + $0x8] sm:$0xff] }
   0x3   :  { %4392 = vmatpush3.msra.mxu0 %v15_v0  ;;  %4399 = vmatpush3.msra.mxu1 %v17_v1  ;;  %v32_v5 = vld [vmem:[%s5292_s1 + $0x30] sm:$0xff]  ;;  %v33_v7 = vld [vmem:[%s5292_s1 + $0x38] sm:$0xff]  ;;  %v19_v8 = vld [vmem:[%s5291_s0 + $0x28] sm:$0xff] }
   0x4   :  { %4393 = vmatprep.subr.mxu0 %v14_v2  ;;  %4400 = vmatprep.subr.mxu1 %v16_v3  ;;  %v21_v9 = vld [vmem:[%s5291_s0 + $0x38] sm:$0xff]  ;;  %v18_v10 = vld [vmem:[%s5291_s0 + $0x20] sm:$0xff]  ;;  %v20_v11 = vld [vmem:[%s5291_s0 + $0x30] sm:$0xff] }
   0x5   :  { %4394 = vmatpush3.msra.mxu0 %v14_v2  ;;  %4395 = vmatprep.mubr.msk.f32.mxu0 %vm46_vm0, %v30_v4  ;;  %v34_v12 = vld [vmem:[%s5292_s1 + $0x60] sm:$0xff]  ;;  %v36_v13 = vld [vmem:[%s5292_s1 + $0x90] sm:$0xff]  ;;  %v35_v14 = vld [vmem:[%s5292_s1 + $0x68] sm:$0xff] }
   0x6   :  { %4401 = vmatpush3.msra.mxu1 %v16_v3  ;;  %4402 = vmatprep.mubr.msk.f32.mxu1 %vm46_vm0, %v32_v5  ;;  %v37_v15 = vld [vmem:[%s5292_s1 + $0x98] sm:$0xff]  ;;  %v23_v16 = vld [vmem:[%s5291_s0 + $0x48] sm:$0xff]  ;;  %v22_v18 = vld [vmem:[%s5291_s0 + $0x40] sm:$0xff] }
   0x7   :  { %4396 = vmatmul.mubr.msk.f32.vlgmr.msra.gmra.mxu0 %vm46_vm0, %v31_v6  ;;  %4403 = vmatmul.mubr.msk.f32.vlgmr.msra.gmra.mxu1 %vm46_vm0, %v33_v7  ;;  %v25_v17 = vld [vmem:[%s5291_s0 + $0x58] sm:$0xff]  ;;  %v24_v19 = vld [vmem:[%s5291_s0 + $0x50] sm:$0xff]  ;;  %v38_v20 = vld [vmem:[%s5292_s1 + $0xc0] sm:$0xff] }
   0x8   :  { %4405 = vmatprep.subr.mxu0 %v19_v8  ;;  %4412 = vmatprep.subr.mxu1 %v21_v9  ;;  %v40_v21 = vld [vmem:[%s5292_s1 + $0xf0] sm:$0xff]  ;;  %v39_v22 = vld [vmem:[%s5292_s1 + $0xc8] sm:$0xff]  ;;  %v41_v23 = vld [vmem:[%s5292_s1 + $0xf8] sm:$0xff] }
   0x9   :  { %4406 = vmatpush3.msra.mxu0 %v19_v8  ;;  %4413 = vmatpush3.msra.mxu1 %v21_v9  ;;  %v27_v24 = vld [vmem:[%s5291_s0 + $0x68] sm:$0xff]  ;;  %v29_v25 = vld [vmem:[%s5291_s0 + $0x78] sm:$0xff]  ;;  %v26_v26 = vld [vmem:[%s5291_s0 + $0x60] sm:$0xff] }
   0xa   :  { %4407 = vmatprep.subr.mxu0 %v18_v10  ;;  %4414 = vmatprep.subr.mxu1 %v20_v11  ;;  %v28_v27 = vld [vmem:[%s5291_s0 + $0x70] sm:$0xff]  ;;  %v42_v28 = vld [vmem:[%s5292_s1 + $0x120] sm:$0xff]  ;;  %v43_v30 = vld [vmem:[%s5292_s1 + $0x128] sm:$0xff] }
   0xb   :  { %4408 = vmatpush3.msra.mxu0 %v18_v10  ;;  %4409 = vmatprep.mubr.msk.f32.mxu0 %vm46_vm0, %v34_v12  ;;  %v44_v29 = vld [vmem:[%s5292_s1 + $0x150] sm:$0xff]  ;;  %v45_v31 = vld [vmem:[%s5292_s1 + $0x158] sm:$0xff]  ;;  %v4057_v33 = vld [vmem:[%s5292_s1 + $0x40] sm:$0xff] }
   0xc   :  { %4415 = vmatpush3.msra.mxu1 %v20_v11  ;;  %4416 = vmatprep.mubr.msk.f32.mxu1 %vm46_vm0, %v36_v13  ;;  %v4055_v32 = vld [vmem:[%s5292_s1 + $0x10] sm:$0xff]  ;;  %v4056_v38 = vld [vmem:[%s5292_s1 + $0x18] sm:$0xff]  ;;  %v4058_v39 = vld [vmem:[%s5292_s1 + $0x48] sm:$0xff] }
   0xd   :  { %4410 = vmatmul.mubr.msk.f32.vlgmr.msra.gmra.mxu0 %vm46_vm0, %v35_v14  ;;  %4417 = vmatmul.mubr.msk.f32.vlgmr.msra.gmra.mxu1 %vm46_vm0, %v37_v15  ;;  %v4059_v40 = vld [vmem:[%s5292_s1 + $0x70] sm:$0xff]  ;;  %v4061_v41 = vld [vmem:[%s5292_s1 + $0xa0] sm:$0xff]  ;;  %v4060_v46 = vld [vmem:[%s5292_s1 + $0x78] sm:$0xff] }
   0xe   :  { %4419 = vmatprep.subr.mxu0 %v23_v16  ;;  %4426 = vmatprep.subr.mxu1 %v25_v17  ;;  %v4062_v47 = vld [vmem:[%s5292_s1 + $0xa8] sm:$0xff]  ;;  %v4063_v48 = vld [vmem:[%s5292_s1 + $0xd0] sm:$0xff]  ;;  %v4065_v49 = vld [vmem:[%s5292_s1 + $0x100] sm:$0xff] }
   0xf   :  { %4420 = vmatpush3.msra.mxu0 %v23_v16  ;;  %4427 = vmatpush3.msra.mxu1 %v25_v17  ;;  %v4064_v54 = vld [vmem:[%s5292_s1 + $0xd8] sm:$0xff]  ;;  %v4066_v55 = vld [vmem:[%s5292_s1 + $0x108] sm:$0xff]  ;;  %v4067_v56 = vld [vmem:[%s5292_s1 + $0x130] sm:$0xff] }
  0x10   :  { %4421 = vmatprep.subr.mxu0 %v22_v18  ;;  %4428 = vmatprep.subr.mxu1 %v24_v19  ;;  %v4069_v57 = vld [vmem:[%s5292_s1 + $0x160] sm:$0xff]  ;;  %v4068_v62 = vld [vmem:[%s5292_s1 + $0x138] sm:$0xff]  ;;  %v4070_v63 = vld [vmem:[%s5292_s1 + $0x168] sm:$0xff] }
  0x11   :  { %4422 = vmatpush3.msra.mxu0 %v22_v18  ;;  %4423 = vmatprep.mubr.msk.f32.mxu0 %vm46_vm0, %v38_v20  ;;  %v4087_v0 = vld [vmem:[%s5292_s1 + $0x20] sm:$0xff]  ;;  %v4089_v1 = vld [vmem:[%s5292_s1 + $0x50] sm:$0xff]  ;;  %v4088_v6 = vld [vmem:[%s5292_s1 + $0x28] sm:$0xff] }
  0x12   :  { %4429 = vmatpush3.msra.mxu1 %v24_v19  ;;  %4430 = vmatprep.mubr.msk.f32.mxu1 %vm46_vm0, %v40_v21  ;;  %v4090_v7 = vld [vmem:[%s5292_s1 + $0x58] sm:$0xff]  ;;  %v4091_v8 = vld [vmem:[%s5292_s1 + $0x80] sm:$0xff]  ;;  %v4093_v9 = vld [vmem:[%s5292_s1 + $0xb0] sm:$0xff] }
  0x13   :  { %4424 = vmatmul.mubr.msk.f32.vlgmr.msra.gmra.mxu0 %vm46_vm0, %v39_v22  ;;  %4431 = vmatmul.mubr.msk.f32.vlgmr.msra.gmra.mxu1 %vm46_vm0, %v41_v23  ;;  %v4092_v14 = vld [vmem:[%s5292_s1 + $0x88] sm:$0xff]  ;;  %v4094_v15 = vld [vmem:[%s5292_s1 + $0xb8] sm:$0xff]  ;;  %v4095_v16 = vld [vmem:[%s5292_s1 + $0xe0] sm:$0xff] }
  0x14   :  { %4433 = vmatprep.subr.mxu0 %v27_v24  ;;  %4440 = vmatprep.subr.mxu1 %v29_v25  ;;  %v4097_v17 = vld [vmem:[%s5292_s1 + $0x110] sm:$0xff]  ;;  %v4096_v22 = vld [vmem:[%s5292_s1 + $0xe8] sm:$0xff]  ;;  %v4098_v23 = vld [vmem:[%s5292_s1 + $0x118] sm:$0xff] }
  0x15   :  { %4434 = vmatpush3.msra.mxu0 %v27_v24  ;;  %4441 = vmatpush3.msra.mxu1 %v29_v25  ;;  %v4099_v24 = vld [vmem:[%s5292_s1 + $0x140] sm:$0xff]  ;;  %v4101_v25 = vld [vmem:[%s5292_s1 + $0x170] sm:$0xff] }
  0x16   :  { %4435 = vmatprep.subr.mxu0 %v26_v26  ;;  %4442 = vmatprep.subr.mxu1 %v28_v27 }
  0x17   :  { %4436 = vmatpush3.msra.mxu0 %v26_v26  ;;  %4437 = vmatprep.mubr.msk.f32.mxu0 %vm46_vm0, %v42_v28 }
  0x18   :  { %4443 = vmatpush3.msra.mxu1 %v28_v27  ;;  %4444 = vmatprep.mubr.msk.f32.mxu1 %vm46_vm0, %v44_v29 }
  0x19   :  { %4438 = vmatmul.mubr.msk.f32.vlgmr.msra.gmra.mxu0 %vm46_vm0, %v43_v30  ;;  %4445 = vmatmul.mubr.msk.f32.vlgmr.msra.gmra.mxu1 %vm46_vm0, %v45_v31  ;;  %v4100_v30 = vld [vmem:[%s5292_s1 + $0x148] sm:$0xff]  ;;  %v4102_v31 = vld [vmem:[%s5292_s1 + $0x178] sm:$0xff] }
  0x1a   :  { %4451 = vmatprep.mubr.msk.f32.mxu0 %vm46_vm0, %v4055_v32  ;;  %4458 = vmatprep.mubr.msk.f32.mxu1 %vm46_vm0, %v4057_v33  ;;  %v4120_v32 = vld [vmem:[%s5293_s2 + $0x18] sm:$0xff]  ;;  %v4122_v33 = vld [vmem:[%s5293_s2 + $0x48] sm:$0xff] }
  0xc7   :  { %v4397_v34 = vpop.f32.mrf.mxu0  ;;  %v4404_v35 = vpop.f32.mrf.mxu1 }
  0xc8   :  { %4447 = vmatprep.subr.mxu0 %v4397_v34  ;;  %4454 = vmatprep.subr.mxu1 %v4404_v35 }
  0xc9   :  { %v119_v36 = vpop.f32.mrf.mxu0  ;;  %v200_v37 = vpop.f32.mrf.mxu1  ;;  %4448 = vmatpush3.msra.mxu0 %v4397_v34  ;;  %4455 = vmatpush3.msra.mxu1 %v4404_v35  ;;  %v4119_v34 = vld [vmem:[%s5293_s2 + $0x10] sm:$0xff]  ;;  %v4121_v35 = vld [vmem:[%s5293_s2 + $0x40] sm:$0xff] }
  0xca   :  { %4449 = vmatprep.subr.mxu0 %v119_v36  ;;  %4456 = vmatprep.subr.mxu1 %v200_v37 }
  0xcb   :  { %4450 = vmatpush3.msra.mxu0 %v119_v36  ;;  %4457 = vmatpush3.msra.mxu1 %v200_v37  ;;  %v2025_v36 = vld [vmem:[%s5293_s2] sm:$0xff]  ;;  %v2027_v37 = vld [vmem:[%s5293_s2 + $0x30] sm:$0xff] }
  0xcc   :  { %4452 = vmatmul.mubr.msk.f32.vlgmr.msra.gmra.mxu0 %vm46_vm0, %v4056_v38  ;;  %4459 = vmatmul.mubr.msk.f32.vlgmr.msra.gmra.mxu1 %vm46_vm0, %v4058_v39  ;;  %v2026_v38 = vld [vmem:[%s5293_s2 + $0x8] sm:$0xff]  ;;  %v2028_v39 = vld [vmem:[%s5293_s2 + $0x38] sm:$0xff] }
  0xcd   :  { %v4411_v42 = vpop.f32.mrf.mxu0  ;;  %v4418_v43 = vpop.f32.mrf.mxu1  ;;  %4465 = vmatprep.mubr.msk.f32.mxu0 %vm46_vm0, %v4059_v40  ;;  %4472 = vmatprep.mubr.msk.f32.mxu1 %vm46_vm0, %v4061_v41  ;;  %v4124_v40 = vld [vmem:[%s5293_s2 + $0x78] sm:$0xff]  ;;  %v4126_v41 = vld [vmem:[%s5293_s2 + $0xa8] sm:$0xff] }
  0xce   :  { %4461 = vmatprep.subr.mxu0 %v4411_v42  ;;  %4468 = vmatprep.subr.mxu1 %v4418_v43 }
  0xcf   :  { %v281_v44 = vpop.f32.mrf.mxu0  ;;  %v362_v45 = vpop.f32.mrf.mxu1  ;;  %4462 = vmatpush3.msra.mxu0 %v4411_v42  ;;  %4469 = vmatpush3.msra.mxu1 %v4418_v43  ;;  %v4123_v42 = vld [vmem:[%s5293_s2 + $0x70] sm:$0xff]  ;;  %v4125_v43 = vld [vmem:[%s5293_s2 + $0xa0] sm:$0xff] }
  0xd0   :  { %4463 = vmatprep.subr.mxu0 %v281_v44  ;;  %4470 = vmatprep.subr.mxu1 %v362_v45 }
  0xd1   :  { %4464 = vmatpush3.msra.mxu0 %v281_v44  ;;  %4471 = vmatpush3.msra.mxu1 %v362_v45  ;;  %v2029_v44 = vld [vmem:[%s5293_s2 + $0x60] sm:$0xff]  ;;  %v2031_v45 = vld [vmem:[%s5293_s2 + $0x90] sm:$0xff] }
  0xd2   :  { %4466 = vmatmul.mubr.msk.f32.vlgmr.msra.gmra.mxu0 %vm46_vm0, %v4060_v46  ;;  %4473 = vmatmul.mubr.msk.f32.vlgmr.msra.gmra.mxu1 %vm46_vm0, %v4062_v47  ;;  %v2030_v46 = vld [vmem:[%s5293_s2 + $0x68] sm:$0xff]  ;;  %v2032_v47 = vld [vmem:[%s5293_s2 + $0x98] sm:$0xff] }
  0xd3   :  { %v4425_v50 = vpop.f32.mrf.mxu0  ;;  %v4432_v51 = vpop.f32.mrf.mxu1  ;;  %4479 = vmatprep.mubr.msk.f32.mxu0 %vm46_vm0, %v4063_v48  ;;  %4486 = vmatprep.mubr.msk.f32.mxu1 %vm46_vm0, %v4065_v49  ;;  %v4128_v48 = vld [vmem:[%s5293_s2 + $0xd8] sm:$0xff]  ;;  %v4130_v49 = vld [vmem:[%s5293_s2 + $0x108] sm:$0xff] }
  0xd4   :  { %4475 = vmatprep.subr.mxu0 %v4425_v50  ;;  %4482 = vmatprep.subr.mxu1 %v4432_v51 }
  0xd5   :  { %v443_v52 = vpop.f32.mrf.mxu0  ;;  %v524_v53 = vpop.f32.mrf.mxu1  ;;  %4476 = vmatpush3.msra.mxu0 %v4425_v50  ;;  %4483 = vmatpush3.msra.mxu1 %v4432_v51  ;;  %v4127_v50 = vld [vmem:[%s5293_s2 + $0xd0] sm:$0xff]  ;;  %v4129_v51 = vld [vmem:[%s5293_s2 + $0x100] sm:$0xff] }
  0xd6   :  { %4477 = vmatprep.subr.mxu0 %v443_v52  ;;  %4484 = vmatprep.subr.mxu1 %v524_v53 }
  0xd7   :  { %4478 = vmatpush3.msra.mxu0 %v443_v52  ;;  %4485 = vmatpush3.msra.mxu1 %v524_v53  ;;  %v2033_v52 = vld [vmem:[%s5293_s2 + $0xc0] sm:$0xff]  ;;  %v2035_v53 = vld [vmem:[%s5293_s2 + $0xf0] sm:$0xff] }
  0xd8   :  { %4480 = vmatmul.mubr.msk.f32.vlgmr.msra.gmra.mxu0 %vm46_vm0, %v4064_v54  ;;  %4487 = vmatmul.mubr.msk.f32.vlgmr.msra.gmra.mxu1 %vm46_vm0, %v4066_v55  ;;  %v2034_v54 = vld [vmem:[%s5293_s2 + $0xc8] sm:$0xff]  ;;  %v2036_v55 = vld [vmem:[%s5293_s2 + $0xf8] sm:$0xff] }
  0xd9   :  { %v4439_v58 = vpop.f32.mrf.mxu0  ;;  %v4446_v59 = vpop.f32.mrf.mxu1  ;;  %4493 = vmatprep.mubr.msk.f32.mxu0 %vm46_vm0, %v4067_v56  ;;  %4500 = vmatprep.mubr.msk.f32.mxu1 %vm46_vm0, %v4069_v57  ;;  %v4132_v56 = vld [vmem:[%s5293_s2 + $0x138] sm:$0xff]  ;;  %v4134_v57 = vld [vmem:[%s5293_s2 + $0x168] sm:$0xff] }
  0xda   :  { %4489 = vmatprep.subr.mxu0 %v4439_v58  ;;  %4496 = vmatprep.subr.mxu1 %v4446_v59 }
  0xdb   :  { %v605_v60 = vpop.f32.mrf.mxu0  ;;  %v686_v61 = vpop.f32.mrf.mxu1  ;;  %4490 = vmatpush3.msra.mxu0 %v4439_v58  ;;  %4497 = vmatpush3.msra.mxu1 %v4446_v59  ;;  %v4131_v58 = vld [vmem:[%s5293_s2 + $0x130] sm:$0xff]  ;;  %v4133_v59 = vld [vmem:[%s5293_s2 + $0x160] sm:$0xff] }
  0xdc   :  { %4491 = vmatprep.subr.mxu0 %v605_v60  ;;  %4498 = vmatprep.subr.mxu1 %v686_v61 }
  0xdd   :  { %4492 = vmatpush3.msra.mxu0 %v605_v60  ;;  %4499 = vmatpush3.msra.mxu1 %v686_v61  ;;  %v2037_v60 = vld [vmem:[%s5293_s2 + $0x120] sm:$0xff]  ;;  %v2039_v61 = vld [vmem:[%s5293_s2 + $0x150] sm:$0xff] }
  0xde   :  { %4494 = vmatmul.mubr.msk.f32.vlgmr.msra.gmra.mxu0 %vm46_vm0, %v4068_v62  ;;  %4501 = vmatmul.mubr.msk.f32.vlgmr.msra.gmra.mxu1 %vm46_vm0, %v4070_v63  ;;  %v2038_v62 = vld [vmem:[%s5293_s2 + $0x128] sm:$0xff]  ;;  %v2040_v63 = vld [vmem:[%s5293_s2 + $0x158] sm:$0xff] }
  0xdf   :  { %4507 = vmatprep.mubr.msk.f32.mxu0 %vm46_vm0, %v4087_v0  ;;  %4514 = vmatprep.mubr.msk.f32.mxu1 %vm46_vm0, %v4089_v1  ;;  %v4152_v0 = vld [vmem:[%s5293_s2 + $0x28] sm:$0xff]  ;;  %v4154_v1 = vld [vmem:[%s5293_s2 + $0x58] sm:$0xff] }
 0x18c   :  { %v4453_v2 = vpop.f32.mrf.mxu0  ;;  %v4460_v3 = vpop.f32.mrf.mxu1 }
 0x18d   :  { %4503 = vmatprep.subr.mxu0 %v4453_v2  ;;  %4510 = vmatprep.subr.mxu1 %v4460_v3 }
 0x18e   :  { %v784_v4 = vpop.f32.mrf.mxu0  ;;  %v865_v5 = vpop.f32.mrf.mxu1  ;;  %4504 = vmatpush3.msra.mxu0 %v4453_v2  ;;  %4511 = vmatpush3.msra.mxu1 %v4460_v3  ;;  %v4151_v2 = vld [vmem:[%s5293_s2 + $0x20] sm:$0xff]  ;;  %v4153_v3 = vld [vmem:[%s5293_s2 + $0x50] sm:$0xff] }
 0x18f   :  { %4505 = vmatprep.subr.mxu0 %v784_v4  ;;  %4512 = vmatprep.subr.mxu1 %v865_v5 }
 0x190   :  { %4506 = vmatpush3.msra.mxu0 %v784_v4  ;;  %4513 = vmatpush3.msra.mxu1 %v865_v5  ;;  %v4156_v4 = vld [vmem:[%s5293_s2 + $0x88] sm:$0xff]  ;;  %v4158_v5 = vld [vmem:[%s5293_s2 + $0xb8] sm:$0xff] }
 0x191   :  { %4508 = vmatmul.mubr.msk.f32.vlgmr.msra.gmra.mxu0 %vm46_vm0, %v4088_v6  ;;  %4515 = vmatmul.mubr.msk.f32.vlgmr.msra.gmra.mxu1 %vm46_vm0, %v4090_v7 }
 0x192   :  { %v4467_v10 = vpop.f32.mrf.mxu0  ;;  %v4474_v11 = vpop.f32.mrf.mxu1  ;;  %4521 = vmatprep.mubr.msk.f32.mxu0 %vm46_vm0, %v4091_v8  ;;  %4528 = vmatprep.mubr.msk.f32.mxu1 %vm46_vm0, %v4093_v9 }
 0x193   :  { %4517 = vmatprep.subr.mxu0 %v4467_v10  ;;  %4524 = vmatprep.subr.mxu1 %v4474_v11 }
 0x194   :  { %v946_v12 = vpop.f32.mrf.mxu0  ;;  %v1027_v13 = vpop.f32.mrf.mxu1  ;;  %4518 = vmatpush3.msra.mxu0 %v4467_v10  ;;  %4525 = vmatpush3.msra.mxu1 %v4474_v11 }
 0x195   :  { %4519 = vmatprep.subr.mxu0 %v946_v12  ;;  %4526 = vmatprep.subr.mxu1 %v1027_v13 }
 0x196   :  { %4520 = vmatpush3.msra.mxu0 %v946_v12  ;;  %4527 = vmatpush3.msra.mxu1 %v1027_v13 }
 0x197   :  { %4522 = vmatmul.mubr.msk.f32.vlgmr.msra.gmra.mxu0 %vm46_vm0, %v4092_v14  ;;  %4529 = vmatmul.mubr.msk.f32.vlgmr.msra.gmra.mxu1 %vm46_vm0, %v4094_v15 }
 0x198   :  { %v4481_v18 = vpop.f32.mrf.mxu0  ;;  %v4488_v19 = vpop.f32.mrf.mxu1  ;;  %4535 = vmatprep.mubr.msk.f32.mxu0 %vm46_vm0, %v4095_v16  ;;  %4542 = vmatprep.mubr.msk.f32.mxu1 %vm46_vm0, %v4097_v17 }
 0x199   :  { %4531 = vmatprep.subr.mxu0 %v4481_v18  ;;  %4538 = vmatprep.subr.mxu1 %v4488_v19 }
 0x19a   :  { %v1108_v20 = vpop.f32.mrf.mxu0  ;;  %v1189_v21 = vpop.f32.mrf.mxu1  ;;  %4532 = vmatpush3.msra.mxu0 %v4481_v18  ;;  %4539 = vmatpush3.msra.mxu1 %v4488_v19 }
 0x19b   :  { %4533 = vmatprep.subr.mxu0 %v1108_v20  ;;  %4540 = vmatprep.subr.mxu1 %v1189_v21 }
 0x19c   :  { %4534 = vmatpush3.msra.mxu0 %v1108_v20  ;;  %4541 = vmatpush3.msra.mxu1 %v1189_v21 }
 0x19d   :  { %4536 = vmatmul.mubr.msk.f32.vlgmr.msra.gmra.mxu0 %vm46_vm0, %v4096_v22  ;;  %4543 = vmatmul.mubr.msk.f32.vlgmr.msra.gmra.mxu1 %vm46_vm0, %v4098_v23 }
 0x19e   :  { %v4495_v26 = vpop.f32.mrf.mxu0  ;;  %v4502_v27 = vpop.f32.mrf.mxu1  ;;  %4549 = vmatprep.mubr.msk.f32.mxu0 %vm46_vm0, %v4099_v24  ;;  %4556 = vmatprep.mubr.msk.f32.mxu1 %vm46_vm0, %v4101_v25 }
 0x19f   :  { %4545 = vmatprep.subr.mxu0 %v4495_v26  ;;  %4552 = vmatprep.subr.mxu1 %v4502_v27 }
 0x1a0   :  { %v1270_v28 = vpop.f32.mrf.mxu0  ;;  %v1351_v29 = vpop.f32.mrf.mxu1  ;;  %4546 = vmatpush3.msra.mxu0 %v4495_v26  ;;  %4553 = vmatpush3.msra.mxu1 %v4502_v27  ;;  %v4155_v26 = vld [vmem:[%s5293_s2 + $0x80] sm:$0xff]  ;;  %v4157_v27 = vld [vmem:[%s5293_s2 + $0xb0] sm:$0xff] }
 0x1a1   :  { %4547 = vmatprep.subr.mxu0 %v1270_v28  ;;  %4554 = vmatprep.subr.mxu1 %v1351_v29 }
 0x1a2   :  { %4548 = vmatpush3.msra.mxu0 %v1270_v28  ;;  %4555 = vmatpush3.msra.mxu1 %v1351_v29  ;;  %v4160_v28 = vld [vmem:[%s5293_s2 + $0xe8] sm:$0xff]  ;;  %v4162_v29 = vld [vmem:[%s5293_s2 + $0x118] sm:$0xff] }
 0x1a3   :  { %4550 = vmatmul.mubr.msk.f32.vlgmr.msra.gmra.mxu0 %vm46_vm0, %v4100_v30  ;;  %4557 = vmatmul.mubr.msk.f32.vlgmr.msra.gmra.mxu1 %vm46_vm0, %v4102_v31 }
 0x1a4   :  { %4559 = vmatprep.subr.mxu0 %v4120_v32  ;;  %4566 = vmatprep.subr.mxu1 %v4122_v33 }
 0x1a5   :  { %4560 = vmatpush3.msra.mxu0 %v4120_v32  ;;  %4567 = vmatpush3.msra.mxu1 %v4122_v33 }
 0x1a6   :  { %4561 = vmatprep.subr.mxu0 %v4119_v34  ;;  %4568 = vmatprep.subr.mxu1 %v4121_v35 }
 0x1a7   :  { %4562 = vmatpush3.msra.mxu0 %v4119_v34  ;;  %4563 = vmatprep.mubr.msk.f32.mxu0 %vm46_vm0, %v2025_v36  ;;  %v4159_v34 = vld [vmem:[%s5293_s2 + $0xe0] sm:$0xff]  ;;  %v4164_v36 = vld [vmem:[%s5293_s2 + $0x148] sm:$0xff] }
 0x1a8   :  { %4569 = vmatpush3.msra.mxu1 %v4121_v35  ;;  %4570 = vmatprep.mubr.msk.f32.mxu1 %vm46_vm0, %v2027_v37  ;;  %v4161_v35 = vld [vmem:[%s5293_s2 + $0x110] sm:$0xff]  ;;  %v4166_v37 = vld [vmem:[%s5293_s2 + $0x178] sm:$0xff] }
 0x1a9   :  { %4564 = vmatmul.mubr.msk.f32.vlgmr.msra.gmra.mxu0 %vm46_vm0, %v2026_v38  ;;  %4571 = vmatmul.mubr.msk.f32.vlgmr.msra.gmra.mxu1 %vm46_vm0, %v2028_v39 }
 0x1aa   :  { %4573 = vmatprep.subr.mxu0 %v4124_v40  ;;  %4580 = vmatprep.subr.mxu1 %v4126_v41 }
 0x1ab   :  { %4574 = vmatpush3.msra.mxu0 %v4124_v40  ;;  %4581 = vmatpush3.msra.mxu1 %v4126_v41 }
 0x1ac   :  { %4575 = vmatprep.subr.mxu0 %v4123_v42  ;;  %4582 = vmatprep.subr.mxu1 %v4125_v43 }
 0x1ad   :  { %4576 = vmatpush3.msra.mxu0 %v4123_v42  ;;  %4577 = vmatprep.mubr.msk.f32.mxu0 %vm46_vm0, %v2029_v44  ;;  %v4163_v42 = vld [vmem:[%s5293_s2 + $0x140] sm:$0xff] }
 0x1ae   :  { %4583 = vmatpush3.msra.mxu1 %v4125_v43  ;;  %4584 = vmatprep.mubr.msk.f32.mxu1 %vm46_vm0, %v2031_v45  ;;  %v4165_v43 = vld [vmem:[%s5293_s2 + $0x170] sm:$0xff] }
 0x1af   :  { %4578 = vmatmul.mubr.msk.f32.vlgmr.msra.gmra.mxu0 %vm46_vm0, %v2030_v46  ;;  %4585 = vmatmul.mubr.msk.f32.vlgmr.msra.gmra.mxu1 %vm46_vm0, %v2032_v47 }
 0x1b0   :  { %4587 = vmatprep.subr.mxu0 %v4128_v48  ;;  %4594 = vmatprep.subr.mxu1 %v4130_v49 }
 0x1b1   :  { %4588 = vmatpush3.msra.mxu0 %v4128_v48  ;;  %4595 = vmatpush3.msra.mxu1 %v4130_v49 }
 0x1b2   :  { %4589 = vmatprep.subr.mxu0 %v4127_v50  ;;  %4596 = vmatprep.subr.mxu1 %v4129_v51 }
 0x1b3   :  { %4590 = vmatpush3.msra.mxu0 %v4127_v50  ;;  %4591 = vmatprep.mubr.msk.f32.mxu0 %vm46_vm0, %v2033_v52 }
 0x1b4   :  { %4597 = vmatpush3.msra.mxu1 %v4129_v51  ;;  %4598 = vmatprep.mubr.msk.f32.mxu1 %vm46_vm0, %v2035_v53 }
 0x1b5   :  { %4592 = vmatmul.mubr.msk.f32.vlgmr.msra.gmra.mxu0 %vm46_vm0, %v2034_v54  ;;  %4599 = vmatmul.mubr.msk.f32.vlgmr.msra.gmra.mxu1 %vm46_vm0, %v2036_v55 }
 0x1b6   :  { %4601 = vmatprep.subr.mxu0 %v4132_v56  ;;  %4608 = vmatprep.subr.mxu1 %v4134_v57 }
 0x1b7   :  { %4602 = vmatpush3.msra.mxu0 %v4132_v56  ;;  %4609 = vmatpush3.msra.mxu1 %v4134_v57 }
 0x1b8   :  { %4603 = vmatprep.subr.mxu0 %v4131_v58  ;;  %4610 = vmatprep.subr.mxu1 %v4133_v59 }
 0x1b9   :  { %4604 = vmatpush3.msra.mxu0 %v4131_v58  ;;  %4605 = vmatprep.mubr.msk.f32.mxu0 %vm46_vm0, %v2037_v60 }
 0x1ba   :  { %4611 = vmatpush3.msra.mxu1 %v4133_v59  ;;  %4612 = vmatprep.mubr.msk.f32.mxu1 %vm46_vm0, %v2039_v61 }
 0x1bb   :  { %4606 = vmatmul.mubr.msk.f32.vlgmr.msra.gmra.mxu0 %vm46_vm0, %v2038_v62  ;;  %4613 = vmatmul.mubr.msk.f32.vlgmr.msra.gmra.mxu1 %vm46_vm0, %v2040_v63 }
 0x1bc   :  { %4615 = vmatprep.subr.mxu0 %v4152_v0  ;;  %4622 = vmatprep.subr.mxu1 %v4154_v1 }
 0x1bd   :  { %4616 = vmatpush3.msra.mxu0 %v4152_v0  ;;  %4623 = vmatpush3.msra.mxu1 %v4154_v1 }
 0x1be   :  { %4617 = vmatprep.subr.mxu0 %v4151_v2  ;;  %4624 = vmatprep.subr.mxu1 %v4153_v3 }
 0x1bf   :  { %4618 = vmatpush3.msra.mxu0 %v4151_v2  ;;  %4625 = vmatpush3.msra.mxu1 %v4153_v3 }
 0x1c0   :  { %4629 = vmatprep.subr.mxu0 %v4156_v4  ;;  %4636 = vmatprep.subr.mxu1 %v4158_v5 }
 0x251   :  { %v5117_v6 = vpop.f32.mrf.mxu0  ;;  %v5119_v7 = vpop.f32.mrf.mxu1 }
 0x253   :  { %v5121_v8 = vpop.f32.mrf.mxu0  ;;  %v5123_v9 = vpop.f32.mrf.mxu1 }
 0x257   :  { %v5125_v10 = vpop.f32.mrf.mxu0  ;;  %v5127_v11 = vpop.f32.mrf.mxu1 }
 0x259   :  { %v5129_v12 = vpop.f32.mrf.mxu0  ;;  %v5131_v13 = vpop.f32.mrf.mxu1 }
 0x25d   :  { %v5133_v14 = vpop.f32.mrf.mxu0  ;;  %v5135_v15 = vpop.f32.mrf.mxu1 }
 0x25f   :  { %v5137_v16 = vpop.f32.mrf.mxu0  ;;  %v5139_v17 = vpop.f32.mrf.mxu1 }
 0x263   :  { %v5141_v18 = vpop.f32.mrf.mxu0  ;;  %v5143_v19 = vpop.f32.mrf.mxu1 }
 0x265   :  { %v5145_v20 = vpop.f32.mrf.mxu0  ;;  %v5147_v21 = vpop.f32.mrf.mxu1 }
 0x269   :  { %v4565_v22 = vpop.f32.mrf.mxu0  ;;  %v4572_v23 = vpop.f32.mrf.mxu1 }
 0x26b   :  { %v2130_v24 = vpop.f32.mrf.mxu0  ;;  %v2211_v25 = vpop.f32.mrf.mxu1 }
 0x26c   :  { %4619 = vmatprep.mubr.msk.f32.mxu0 %vm46_vm0, %v2130_v24  ;;  %4626 = vmatprep.mubr.msk.f32.mxu1 %vm46_vm0, %v2211_v25 }
 0x26d   :  { %4620 = vmatmul.mubr.msk.f32.vlgmr.msra.gmra.mxu0 %vm46_vm0, %v4565_v22  ;;  %4627 = vmatmul.mubr.msk.f32.vlgmr.msra.gmra.mxu1 %vm46_vm0, %v4572_v23 }
 0x26e   :  { %4630 = vmatpush3.msra.mxu0 %v4156_v4  ;;  %4637 = vmatpush3.msra.mxu1 %v4158_v5 }
 0x26f   :  { %v4579_v30 = vpop.f32.mrf.mxu0  ;;  %v4586_v31 = vpop.f32.mrf.mxu1  ;;  %4631 = vmatprep.subr.mxu0 %v4155_v26  ;;  %4638 = vmatprep.subr.mxu1 %v4157_v27 }
 0x270   :  { %4632 = vmatpush3.msra.mxu0 %v4155_v26  ;;  %4639 = vmatpush3.msra.mxu1 %v4157_v27 }
 0x271   :  { %v2292_v32 = vpop.f32.mrf.mxu0  ;;  %v2373_v33 = vpop.f32.mrf.mxu1  ;;  %4643 = vmatprep.subr.mxu0 %v4160_v28  ;;  %4650 = vmatprep.subr.mxu1 %v4162_v29 }
 0x272   :  { %4633 = vmatprep.mubr.msk.f32.mxu0 %vm46_vm0, %v2292_v32  ;;  %4640 = vmatprep.mubr.msk.f32.mxu1 %vm46_vm0, %v2373_v33 }
 0x273   :  { %4634 = vmatmul.mubr.msk.f32.vlgmr.msra.gmra.mxu0 %vm46_vm0, %v4579_v30  ;;  %4641 = vmatmul.mubr.msk.f32.vlgmr.msra.gmra.mxu1 %vm46_vm0, %v4586_v31 }
 0x274   :  { %4644 = vmatpush3.msra.mxu0 %v4160_v28  ;;  %4651 = vmatpush3.msra.mxu1 %v4162_v29 }
 0x275   :  { %v4593_v38 = vpop.f32.mrf.mxu0  ;;  %v4600_v39 = vpop.f32.mrf.mxu1  ;;  %4645 = vmatprep.subr.mxu0 %v4159_v34  ;;  %4652 = vmatprep.subr.mxu1 %v4161_v35 }
 0x276   :  { %4646 = vmatpush3.msra.mxu0 %v4159_v34  ;;  %4653 = vmatpush3.msra.mxu1 %v4161_v35 }
 0x277   :  { %v2454_v40 = vpop.f32.mrf.mxu0  ;;  %v2535_v41 = vpop.f32.mrf.mxu1  ;;  %4657 = vmatprep.subr.mxu0 %v4164_v36  ;;  %4664 = vmatprep.subr.mxu1 %v4166_v37 }
 0x278   :  { %4647 = vmatprep.mubr.msk.f32.mxu0 %vm46_vm0, %v2454_v40  ;;  %4654 = vmatprep.mubr.msk.f32.mxu1 %vm46_vm0, %v2535_v41 }
 0x279   :  { %4648 = vmatmul.mubr.msk.f32.vlgmr.msra.gmra.mxu0 %vm46_vm0, %v4593_v38  ;;  %4655 = vmatmul.mubr.msk.f32.vlgmr.msra.gmra.mxu1 %vm46_vm0, %v4600_v39 }
 0x27a   :  { %4658 = vmatpush3.msra.mxu0 %v4164_v36  ;;  %4665 = vmatpush3.msra.mxu1 %v4166_v37 }
 0x27b   :  { %v4607_v44 = vpop.f32.mrf.mxu0  ;;  %v4614_v45 = vpop.f32.mrf.mxu1  ;;  %4659 = vmatprep.subr.mxu0 %v4163_v42  ;;  %4666 = vmatprep.subr.mxu1 %v4165_v43 }
 0x27c   :  { %4660 = vmatpush3.msra.mxu0 %v4163_v42  ;;  %4667 = vmatpush3.msra.mxu1 %v4165_v43 }
 0x27d   :  { %v2616_v46 = vpop.f32.mrf.mxu0  ;;  %v2697_v47 = vpop.f32.mrf.mxu1 }
 0x27e   :  { %4661 = vmatprep.mubr.msk.f32.mxu0 %vm46_vm0, %v2616_v46  ;;  %4668 = vmatprep.mubr.msk.f32.mxu1 %vm46_vm0, %v2697_v47 }
 0x27f   :  { %4662 = vmatmul.mubr.msk.f32.vlgmr.msra.gmra.mxu0 %vm46_vm0, %v4607_v44  ;;  %4669 = vmatmul.mubr.msk.f32.vlgmr.msra.gmra.mxu1 %vm46_vm0, %v4614_v45 }
 0x280   :  { %4675 = vmatprep.mubr.msk.f32.mxu0 %vm46_vm0, %v5121_v8  ;;  %4682 = vmatprep.mubr.msk.f32.mxu1 %vm46_vm0, %v5123_v9 }
 0x32d   :  { %v4621_v48 = vpop.f32.mrf.mxu0  ;;  %v4628_v49 = vpop.f32.mrf.mxu1 }
 0x32e   :  { %4671 = vmatprep.subr.mxu0 %v4621_v48  ;;  %4678 = vmatprep.subr.mxu1 %v4628_v49 }
 0x32f   :  { %v2795_v50 = vpop.f32.mrf.mxu0  ;;  %v2876_v51 = vpop.f32.mrf.mxu1  ;;  %4672 = vmatpush3.msra.mxu0 %v4621_v48  ;;  %4679 = vmatpush3.msra.mxu1 %v4628_v49 }
 0x330   :  { %4673 = vmatprep.subr.mxu0 %v2795_v50  ;;  %4680 = vmatprep.subr.mxu1 %v2876_v51 }
 0x331   :  { %4674 = vmatpush3.msra.mxu0 %v2795_v50  ;;  %4681 = vmatpush3.msra.mxu1 %v2876_v51 }
 0x332   :  { %4676 = vmatmul.mubr.msk.f32.vlgmr.msra.gmra.mxu0 %vm46_vm0, %v5117_v6  ;;  %4683 = vmatmul.mubr.msk.f32.vlgmr.msra.gmra.mxu1 %vm46_vm0, %v5119_v7 }
 0x333   :  { %v4635_v52 = vpop.f32.mrf.mxu0  ;;  %v4642_v53 = vpop.f32.mrf.mxu1  ;;  %4689 = vmatprep.mubr.msk.f32.mxu0 %vm46_vm0, %v5129_v12  ;;  %4696 = vmatprep.mubr.msk.f32.mxu1 %vm46_vm0, %v5131_v13 }
 0x334   :  { %4685 = vmatprep.subr.mxu0 %v4635_v52  ;;  %4692 = vmatprep.subr.mxu1 %v4642_v53 }
 0x335   :  { %v2957_v54 = vpop.f32.mrf.mxu0  ;;  %v3038_v55 = vpop.f32.mrf.mxu1  ;;  %4686 = vmatpush3.msra.mxu0 %v4635_v52  ;;  %4693 = vmatpush3.msra.mxu1 %v4642_v53 }
 0x336   :  { %4687 = vmatprep.subr.mxu0 %v2957_v54  ;;  %4694 = vmatprep.subr.mxu1 %v3038_v55 }
 0x337   :  { %4688 = vmatpush3.msra.mxu0 %v2957_v54  ;;  %4695 = vmatpush3.msra.mxu1 %v3038_v55 }
 0x338   :  { %4690 = vmatmul.mubr.msk.f32.vlgmr.msra.gmra.mxu0 %vm46_vm0, %v5125_v10  ;;  %4697 = vmatmul.mubr.msk.f32.vlgmr.msra.gmra.mxu1 %vm46_vm0, %v5127_v11 }
 0x339   :  { %v4649_v56 = vpop.f32.mrf.mxu0  ;;  %v4656_v57 = vpop.f32.mrf.mxu1  ;;  %4703 = vmatprep.mubr.msk.f32.mxu0 %vm46_vm0, %v5137_v16  ;;  %4710 = vmatprep.mubr.msk.f32.mxu1 %vm46_vm0, %v5139_v17 }
 0x33a   :  { %4699 = vmatprep.subr.mxu0 %v4649_v56  ;;  %4706 = vmatprep.subr.mxu1 %v4656_v57 }
 0x33b   :  { %v3119_v58 = vpop.f32.mrf.mxu0  ;;  %v3200_v59 = vpop.f32.mrf.mxu1  ;;  %4700 = vmatpush3.msra.mxu0 %v4649_v56  ;;  %4707 = vmatpush3.msra.mxu1 %v4656_v57 }
 0x33c   :  { %4701 = vmatprep.subr.mxu0 %v3119_v58  ;;  %4708 = vmatprep.subr.mxu1 %v3200_v59 }
 0x33d   :  { %4702 = vmatpush3.msra.mxu0 %v3119_v58  ;;  %4709 = vmatpush3.msra.mxu1 %v3200_v59 }
 0x33e   :  { %4704 = vmatmul.mubr.msk.f32.vlgmr.msra.gmra.mxu0 %vm46_vm0, %v5133_v14  ;;  %4711 = vmatmul.mubr.msk.f32.vlgmr.msra.gmra.mxu1 %vm46_vm0, %v5135_v15 }
 0x33f   :  { %v4663_v60 = vpop.f32.mrf.mxu0  ;;  %v4670_v61 = vpop.f32.mrf.mxu1  ;;  %4717 = vmatprep.mubr.msk.f32.mxu0 %vm46_vm0, %v5145_v20  ;;  %4724 = vmatprep.mubr.msk.f32.mxu1 %vm46_vm0, %v5147_v21 }
 0x340   :  { %4713 = vmatprep.subr.mxu0 %v4663_v60  ;;  %4720 = vmatprep.subr.mxu1 %v4670_v61 }
 0x341   :  { %v3281_v62 = vpop.f32.mrf.mxu0  ;;  %v3362_v63 = vpop.f32.mrf.mxu1  ;;  %4714 = vmatpush3.msra.mxu0 %v4663_v60  ;;  %4721 = vmatpush3.msra.mxu1 %v4670_v61 }
 0x342   :  { %4715 = vmatprep.subr.mxu0 %v3281_v62  ;;  %4722 = vmatprep.subr.mxu1 %v3362_v63 }
 0x343   :  { %4716 = vmatpush3.msra.mxu0 %v3281_v62  ;;  %4723 = vmatpush3.msra.mxu1 %v3362_v63 }
 0x344   :  { %4718 = vmatmul.mubr.msk.f32.vlgmr.msra.gmra.mxu0 %vm46_vm0, %v5141_v18  ;;  %4725 = vmatmul.mubr.msk.f32.vlgmr.msra.gmra.mxu1 %vm46_vm0, %v5143_v19 }
 0x3f2   :  { %v4677_v0 = vpop.f32.mrf.mxu0  ;;  %v4684_v1 = vpop.f32.mrf.mxu1 }
 0x3f3   :  { %4020 = vst.msk [vmem:[%s5294_s3 + $0x8] sm:$0xff] %vm46_vm0, %v4677_v0  ;;  %4022 = vst.msk [vmem:[%s5294_s3 + $0x18] sm:$0xff] %vm46_vm0, %v4684_v1 }
 0x3f4   :  { %v3443_v2 = vpop.f32.mrf.mxu0  ;;  %v3524_v3 = vpop.f32.mrf.mxu1 }
 0x3f5   :  { %4019 = vst.msk [vmem:[%s5294_s3] sm:$0xff] %vm46_vm0, %v3443_v2  ;;  %4021 = vst.msk [vmem:[%s5294_s3 + $0x10] sm:$0xff] %vm46_vm0, %v3524_v3 }
 0x3f8   :  { %v4691_v4 = vpop.f32.mrf.mxu0  ;;  %v4698_v5 = vpop.f32.mrf.mxu1 }
 0x3f9   :  { %4024 = vst.msk [vmem:[%s5294_s3 + $0x28] sm:$0xff] %vm46_vm0, %v4691_v4  ;;  %4026 = vst.msk [vmem:[%s5294_s3 + $0x38] sm:$0xff] %vm46_vm0, %v4698_v5 }
 0x3fa   :  { %v3605_v6 = vpop.f32.mrf.mxu0  ;;  %v3686_v7 = vpop.f32.mrf.mxu1 }
 0x3fb   :  { %4023 = vst.msk [vmem:[%s5294_s3 + $0x20] sm:$0xff] %vm46_vm0, %v3605_v6  ;;  %4025 = vst.msk [vmem:[%s5294_s3 + $0x30] sm:$0xff] %vm46_vm0, %v3686_v7 }
 0x3fe   :  { %v4705_v8 = vpop.f32.mrf.mxu0  ;;  %v4712_v9 = vpop.f32.mrf.mxu1 }
 0x3ff   :  { %4028 = vst.msk [vmem:[%s5294_s3 + $0x48] sm:$0xff] %vm46_vm0, %v4705_v8  ;;  %4030 = vst.msk [vmem:[%s5294_s3 + $0x58] sm:$0xff] %vm46_vm0, %v4712_v9 }
 0x400   :  { %v3767_v10 = vpop.f32.mrf.mxu0  ;;  %v3848_v11 = vpop.f32.mrf.mxu1 }
 0x401   :  { %4027 = vst.msk [vmem:[%s5294_s3 + $0x40] sm:$0xff] %vm46_vm0, %v3767_v10  ;;  %4029 = vst.msk [vmem:[%s5294_s3 + $0x50] sm:$0xff] %vm46_vm0, %v3848_v11 }
 0x404   :  { %v4719_v12 = vpop.f32.mrf.mxu0  ;;  %v4726_v13 = vpop.f32.mrf.mxu1 }
 0x405   :  { %4032 = vst.msk [vmem:[%s5294_s3 + $0x68] sm:$0xff] %vm46_vm0, %v4719_v12  ;;  %4034 = vst.msk [vmem:[%s5294_s3 + $0x78] sm:$0xff] %vm46_vm0, %v4726_v13 }
 0x406   :  { %v3929_v14 = vpop.f32.mrf.mxu0  ;;  %v4010_v15 = vpop.f32.mrf.mxu1 }
 0x407   :  { %4031 = vst.msk [vmem:[%s5294_s3 + $0x60] sm:$0xff] %vm46_vm0, %v3929_v14  ;;  %4033 = vst.msk [vmem:[%s5294_s3 + $0x70] sm:$0xff] %vm46_vm0, %v4010_v15 }

</bundles_post_ra>
